<compile_context>
chip_gen: v7x
topology: tpu7x:2x2x1
jax: 0.10.0
libtpu: 0.0.40
codegen_flags: <defaults>
</compile_context>

<pallas_src>
import functools

import jax
import jax.numpy as jnp
from jax.experimental import pallas as pl
from jax.experimental.pallas import tpu as pltpu


_BLOCK_CAP_BYTES = 4 << 20     # per-input block (native dtype); x2 inputs x2 bufs
_VMEM_LIMIT_BYTES = 48 << 20   # scoped VMEM request (< 64 MiB physical on v7x)


def _round_up(x, m):
    return (x + m - 1) // m * m


def _cdiv(a, b):
    return (a + b - 1) // b


def _pick_row_block(num_rows, spatial, itemsizes):
    """Rows per grid step.

    - multiple of the sublane tile (8 for f32, 16 for bf16/f16, 32 for 8-bit),
    - per-input block <= ~4 MiB (2 inputs x 2 buffers = 16 MiB in flight),
    - small enough that the grid keeps >= 2 steps (v7x megacore) when R allows.
    """
    sub = max(8 * max(1, 4 // int(s)) for s in itemsizes)
    row_bytes = spatial * max(int(s) for s in itemsizes)
    cap = max(sub, (_BLOCK_CAP_BYTES // max(row_bytes, 1)) // sub * sub)
    # TODO(synk): if a single row blows past the block budget (huge H*W, i.e.
    # spatial*itemsize > _BLOCK_CAP_BYTES), split the spatial axis onto a
    # second "arbitrary" grid dim with an online-LSE accumulator instead.
    two_steps = _round_up(_cdiv(num_rows, 2), sub)
    return max(sub, min(cap, two_steps, _round_up(num_rows, sub)))


def _joints_kl_kernel(epsilon, pred_ref, tgt_ref, loss_ref):
    # pred_ref / tgt_ref: (rblk, S) blocks in the inputs' native dtype.
    # loss_ref: (1, 1, rblk) f32 lane-dense output block.
    pred = pred_ref[...].astype(jnp.float32)
    gt = tgt_ref[...].astype(jnp.float32)
    if epsilon:
        gt = gt + epsilon

    # Row-wise log-softmax pieces (per-row (rblk, 1) scalars).
    m = jnp.max(pred, axis=-1, keepdims=True)
    lse = jnp.log(jnp.sum(jnp.exp(pred - m), axis=-1, keepdims=True))

    # Target normalizer: one reciprocal / log per row (hoisted out of the
    # per-element math).
    gt_sum = jnp.sum(gt, axis=-1, keepdims=True)
    inv = 1.0 / gt_sum

    # KL pointwise term, refactored so all per-row terms fold into a single
    # broadcast constant:
    #   gt_n * (log(gt_n) - logp) = (gt * inv) * (log(gt) - pred + c)
    #   c = m + lse - log(gt_sum)
    # Per element: one log, a compare/select and a few VPU mul/add — no divide.
    c = m + lse - jnp.log(gt_sum)
    gt_n = gt * inv
    kl = jnp.where(gt_n > 0, gt_n * (jnp.log(gt) - pred + c), 0.0)

    row_loss = jnp.sum(kl, axis=-1)                    # (rblk,)
    loss_ref[...] = row_loss.reshape(loss_ref.shape)   # lane-dense (1, 1, rblk)


@functools.partial(jax.jit, static_argnames=("reduction", "epsilon"))
def joints_kl_loss(output, target, target_weight=None, reduction="mean",
                   epsilon=0.0):
    B, K, H, W = output.shape
    S = H * W
    R = B * K

    # Keep the native dtype: reshape is metadata-only, the f32 upcast happens
    # inside the kernel (halves HBM traffic for bf16 inputs).
    pred = output.reshape(R, S)
    gt = target.reshape(R, S)

    rblk = _pick_row_block(R, S, (pred.dtype.itemsize, gt.dtype.itemsize))
    G = _cdiv(R, rblk)          # no wrapper-side padding; tail block is partial

    row_spec = pl.BlockSpec((rblk, S), lambda i: (i, 0))

    out = pl.pallas_call(
        functools.partial(_joints_kl_kernel, float(epsilon)),
        out_shape=jax.ShapeDtypeStruct((G, 1, rblk), jnp.float32),
        grid_spec=pltpu.PrefetchScalarGridSpec(
            num_scalar_prefetch=0,
            grid=(G,),
            in_specs=[row_spec, row_spec],
            out_specs=pl.BlockSpec((1, 1, rblk), lambda i: (i, 0, 0)),
        ),
        compiler_params=pltpu.CompilerParams(
            dimension_semantics=("parallel",),
            vmem_limit_bytes=_VMEM_LIMIT_BYTES,
        ),
    )(pred, gt)

    # Drop the (garbage) tail rows of the last block, restore (B, K).
    loss = out.reshape(G * rblk)[:R].reshape(B, K)

    if target_weight is not None:
        loss = loss * target_weight.reshape(B, K)

    if reduction == "mean":
        return jnp.mean(loss)
    elif reduction == "none":
        return jnp.mean(loss, axis=-1)
    return loss  # TODO(synk): PyTorch only documents 'mean'/'none'; raw (B,K) otherwise.


def joints_kl_loss_ref(output, target, target_weight=None, reduction="mean",
                       epsilon=0.0):
    """Pure-JAX reference mirroring the PyTorch forward."""
    B, K, H, W = output.shape
    pred = output.reshape(B, K, -1).astype(jnp.float32)
    logp = jax.nn.log_softmax(pred, axis=-1)
    gt = target.reshape(B, K, -1).astype(jnp.float32) + epsilon
    gt = gt / jnp.sum(gt, axis=-1, keepdims=True)
    pointwise = jnp.where(gt > 0, gt * (jnp.log(gt) - logp), 0.0)
    loss = jnp.sum(pointwise, axis=-1)
    if target_weight is not None:
        loss = loss * target_weight.reshape(B, K)
    if reduction == "mean":
        return jnp.mean(loss)
    elif reduction == "none":
        return jnp.mean(loss, axis=-1)
    return loss


if __name__ == "__main__":
    key = jax.random.PRNGKey(0)
    k1, k2, k3 = jax.random.split(key, 3)

    B, K, H, W = 2, 4, 16, 16
    output = jax.random.normal(k1, (B, K, H, W), dtype=jnp.float32)
    target = jax.random.uniform(k2, (B, K, H, W), dtype=jnp.float32,
                                minval=0.0, maxval=1.0)
    target_weight = jax.random.uniform(k3, (B, K), dtype=jnp.float32)

    # 1) default: reduction='mean', no weight
    got = jax.block_until_ready(joints_kl_loss(output, target))
    ref = jax.block_until_ready(joints_kl_loss_ref(output, target))
    assert jnp.allclose(got, ref, rtol=2e-4, atol=1e-5), (got, ref)

    # 2) with target_weight, reduction='mean'
    got_w = jax.block_until_ready(
        joints_kl_loss(output, target, target_weight=target_weight))
    ref_w = jax.block_until_ready(
        joints_kl_loss_ref(output, target, target_weight=target_weight))
    assert jnp.allclose(got_w, ref_w, rtol=2e-4, atol=1e-5), (got_w, ref_w)

    # 3) reduction='none' -> shape (B,)
    got_n = jax.block_until_ready(
        joints_kl_loss(output, target, reduction="none"))
    ref_n = jax.block_until_ready(
        joints_kl_loss_ref(output, target, reduction="none"))
    assert got_n.shape == (B,)
    assert jnp.allclose(got_n, ref_n, rtol=2e-4, atol=1e-5), (got_n, ref_n)

    # 4) non-divisible row count (exercises the unpadded tail block) + epsilon
    B2, K2 = 3, 5
    out2 = jax.random.normal(k1, (B2, K2, H, W), dtype=jnp.float32)
    tgt2 = jax.random.uniform(k2, (B2, K2, H, W), dtype=jnp.float32,
                              minval=0.0, maxval=1.0)
    got2 = jax.block_until_ready(joints_kl_loss(out2, tgt2, epsilon=1e-6))
    ref2 = jax.block_until_ready(joints_kl_loss_ref(out2, tgt2, epsilon=1e-6))
    assert jnp.allclose(got2, ref2, rtol=2e-4, atol=1e-5), (got2, ref2)

    # 5) bf16 inputs stay bf16 through the DMA; upcast happens in-kernel
    out_bf = output.astype(jnp.bfloat16)
    tgt_bf = target.astype(jnp.bfloat16)
    got_bf = jax.block_until_ready(joints_kl_loss(out_bf, tgt_bf))
    ref_bf = jax.block_until_ready(joints_kl_loss_ref(out_bf, tgt_bf))
    assert jnp.allclose(got_bf, ref_bf, rtol=1e-3, atol=1e-4), (got_bf, ref_bf)

    print("KERNEL_OK")
</pallas_src>

<mosaic_0001>
module attributes {stable_mosaic.version = 11 : i64} {
  func.func @_joints_kl_kernel(%arg0: i32, %arg1: memref<8x256xf32, #tpu.memory_space<vmem>>, %arg2: memref<8x256xf32, #tpu.memory_space<vmem>>, %arg3: memref<1x1x8xf32, #tpu.memory_space<vmem>>) attributes {dimension_semantics = [#tpu.dimension_semantics<parallel>], iteration_bounds = array<i64: 1>, scalar_prefetch = 0 : i64, scratch_operands = 0 : i64, tpu.core_type = #tpu.core_type<tc>, window_params = [{transform_indices = @transform_0, window_bounds = array<i64: 8, 256>}, {transform_indices = @transform_1, window_bounds = array<i64: 8, 256>}, {transform_indices = @transform_2, window_bounds = array<i64: 1, 1, 8>}]} {
    %c0 = arith.constant 0 : index
    %c0_0 = arith.constant 0 : index
    %0 = vector.load %arg1[%c0, %c0_0] : memref<8x256xf32, #tpu.memory_space<vmem>>, vector<8x256xf32>
    %c0_1 = arith.constant 0 : index
    %c0_2 = arith.constant 0 : index
    %1 = vector.load %arg2[%c0_1, %c0_2] : memref<8x256xf32, #tpu.memory_space<vmem>>, vector<8x256xf32>
    %cst = arith.constant dense<0xFF800000> : vector<8xf32>
    %2 = vector.multi_reduction <maximumf>, %0, %cst [1] : vector<8x256xf32> to vector<8xf32>
    %3 = vector.shape_cast %2 : vector<8xf32> to vector<8x1xf32>
    %4 = vector.broadcast %3 : vector<8x1xf32> to vector<8x256xf32>
    %5 = arith.subf %0, %4 : vector<8x256xf32>
    %6 = math.exp %5 : vector<8x256xf32>
    %cst_3 = arith.constant dense<0.000000e+00> : vector<8xf32>
    %7 = vector.multi_reduction <add>, %6, %cst_3 [1] : vector<8x256xf32> to vector<8xf32>
    %8 = vector.shape_cast %7 : vector<8xf32> to vector<8x1xf32>
    %9 = math.log %8 : vector<8x1xf32>
    %cst_4 = arith.constant dense<0.000000e+00> : vector<8xf32>
    %10 = vector.multi_reduction <add>, %1, %cst_4 [1] : vector<8x256xf32> to vector<8xf32>
    %11 = vector.shape_cast %10 : vector<8xf32> to vector<8x1xf32>
    %cst_5 = arith.constant 1.000000e+00 : f32
    %12 = vector.broadcast %cst_5 : f32 to vector<8x1xf32>
    %13 = arith.divf %12, %11 : vector<8x1xf32>
    %14 = arith.addf %3, %9 : vector<8x1xf32>
    %15 = math.log %11 : vector<8x1xf32>
    %16 = arith.subf %14, %15 : vector<8x1xf32>
    %17 = vector.broadcast %13 : vector<8x1xf32> to vector<8x256xf32>
    %18 = arith.mulf %1, %17 : vector<8x256xf32>
    %cst_6 = arith.constant 0.000000e+00 : f32
    %19 = vector.broadcast %cst_6 : f32 to vector<8x256xf32>
    %20 = arith.cmpf ogt, %18, %19 : vector<8x256xf32>
    %21 = math.log %1 : vector<8x256xf32>
    %22 = arith.subf %21, %0 : vector<8x256xf32>
    %23 = vector.broadcast %16 : vector<8x1xf32> to vector<8x256xf32>
    %24 = arith.addf %22, %23 : vector<8x256xf32>
    %25 = arith.mulf %18, %24 : vector<8x256xf32>
    %cst_7 = arith.constant 0.000000e+00 : f32
    %26 = vector.broadcast %cst_7 : f32 to vector<8x256xf32>
    %27 = arith.select %20, %25, %26 : vector<8x256xi1>, vector<8x256xf32>
    %cst_8 = arith.constant dense<0.000000e+00> : vector<8xf32>
    %28 = vector.multi_reduction <add>, %27, %cst_8 [1] : vector<8x256xf32> to vector<8xf32>
    %29 = vector.shape_cast %28 : vector<8xf32> to vector<1x1x8xf32>
    %c0_9 = arith.constant 0 : index
    %c0_10 = arith.constant 0 : index
    %c0_11 = arith.constant 0 : index
    %30 = vector.load %arg3[%c0_9, %c0_10, %c0_11] : memref<1x1x8xf32, #tpu.memory_space<vmem>>, vector<1x1x8xf32>
    tpu.vector_store %arg3[%c0_9, %c0_10, %c0_11], %29 {strides = array<i32>} : memref<1x1x8xf32, #tpu.memory_space<vmem>>, vector<1x1x8xf32>,
    return
  }
  func.func @transform_0(%arg0: i32) -> (i32, i32) {
    %c0_i32 = arith.constant 0 : i32
    %c0_i32_0 = arith.constant 0 : i32
    return %arg0, %c0_i32 : i32, i32
  }
  func.func @transform_1(%arg0: i32) -> (i32, i32) {
    %c0_i32 = arith.constant 0 : i32
    %c0_i32_0 = arith.constant 0 : i32
    return %arg0, %c0_i32 : i32, i32
  }
  func.func @transform_2(%arg0: i32) -> (i32, i32, i32) {
    %c0_i32 = arith.constant 0 : i32
    %c0_i32_0 = arith.constant 0 : i32
    %c0_i32_1 = arith.constant 0 : i32
    return %arg0, %c0_i32, %c0_i32_0 : i32, i32, i32
  }
}

</mosaic_0001>

<bundles_post_ra>
// kernel: joints_kl_loss.1
= control target key start
LH: loop header
LB: loop body
LE: loop exit
PB: predicated region body
PF: predicated region fallthrough
CT: control target
= control target key end

     0   :  { %v58_v38 = vlaneseq  ;;  %vm65_vm2 = vcmask 57344   ;;  %s115_s0 = inlined_call_operand.vmem [shape: f32[8,256], index: 0, kind: input, shape index: {}]   ;;  %s116_s1 = inlined_call_operand.vmem [shape: f32[8,256], index: 1, kind: input, shape index: {}]   ;;  %s117_s2 = inlined_call_operand.vmem [shape: f32[1,1,8], index: 2, kind: output, shape index: {}]  }
   0x1   :  { %v11_v0 = vld [vmem:[%s115_s0] sm:$0xff]  ;;  %v12_v1 = vld [vmem:[%s115_s0 + $0x8] sm:$0xff] }
   0x2   :  { %v15_v2 = vmax.f32 %v11_v0, %v12_v1  ;;  %v13_v3 = vld [vmem:[%s116_s1] sm:$0xff]  ;;  %v14_v4 = vld [vmem:[%s116_s1 + $0x8] sm:$0xff]  ;;  %v59_v39 = vand.u32 127, %v58_v38  ;;  %v61_v40 = vshrl.u32 %v58_v38, 7 }
   0x3   :  { %v29_v5 = vadd.f32 %v14_v4, %v13_v3 }
   0x4   :  { %16 = vmax.xlane.f32.xlu0 %v15_v2  ;;  %v62_v41 = vsub.s32 %v59_v39, %v61_v40 }
   0x5   :  { %30 = vadd.xlane.f32.xlu1 %v29_v5 }
  0x91   :  { %v17_v6 = vpop.xlane.xlu0 %16 }
  0x92   :  { %v18_v7 = vsub.f32 %v11_v0, %v17_v6  ;;  %v19_v8 = vsub.f32 %v12_v1, %v17_v6  ;;  %v31_v14 = vpop.xlane.xlu1 %30 }
  0x94   :  { %v20_v9 = vmul.f32 1.442695, %v18_v7  ;;  %v22_v10 = vmul.f32 1.442695, %v19_v8 }
  0x96   :  { %71 = vpow2.f32 %v20_v9 }
  0x97   :  { %73 = vpow2.f32 %v22_v10 }
  0x98   :  { %75 = vlog2.f32 %v13_v3 }
  0x99   :  { %77 = vlog2.f32 %v14_v4 }
  0x9a   :  { %79 = vlog2.f32 %v31_v14 }
  0xa0   :  { %v72_v11 = vpop.eup %71 }
  0xa1   :  { %v74_v12 = vpop.eup %73 }
  0xa2   :  { %v24_v13 = vadd.f32 %v74_v12, %v72_v11  ;;  %v76_v16 = vpop.eup %75 }
  0xa3   :  { %v78_v17 = vpop.eup %77  ;;  %v43_v19 = vmul.f32 0.6931472, %v76_v16 }
  0xa4   :  { %25 = vadd.xlane.f32.xlu0 %v24_v13  ;;  %v80_v18 = vpop.eup %79  ;;  %v45_v20 = vmul.f32 0.6931472, %v78_v17 }
  0xa5   :  { %v36_v23 = vmul.f32 0.6931472, %v80_v18  ;;  %v46_v26 = vsub.f32 %v43_v19, %v11_v0 }
  0xa6   :  { %v47_v27 = vsub.f32 %v45_v20, %v12_v1 }
 0x131   :  { %v26_v15 = vpop.xlane.xlu0 %25 }
 0x132   :  { %81 = vlog2.f32 %v26_v15 }
 0x133   :  { %83 = vrcp.f32 %v31_v14 }
 0x13c   :  { %v82_v21 = vpop.eup %81 }
 0x13d   :  { %v28_v22 = vmul.f32 0.6931472, %v82_v21  ;;  %v84_v24 = vpop.eup %83 }
 0x13e   :  { %v38_v29 = vmul.f32 %v84_v24, %v13_v3  ;;  %v39_v30 = vmul.f32 %v84_v24, %v14_v4 }
 0x13f   :  { %v34_v25 = vadd.f32 %v28_v22, %v17_v6 }
 0x140   :  { %vm40_vm0 = vcmp.gt.f32.partialorder %v38_v29, 0.0  ;;  %vm41_vm1 = vcmp.gt.f32.partialorder %v39_v30, 0.0 }
 0x141   :  { %v37_v28 = vsub.f32 %v34_v25, %v36_v23 }
 0x143   :  { %v48_v31 = vadd.f32 %v46_v26, %v37_v28  ;;  %v49_v32 = vadd.f32 %v47_v27, %v37_v28 }
 0x145   :  { %v50_v33 = vmul.f32 %v48_v31, %v38_v29  ;;  %v51_v34 = vmul.f32 %v49_v32, %v39_v30 }
 0x147   :  { %v52_v35 = vsel %vm40_vm0, %v50_v33, 0.0  ;;  %v53_v36 = vsel %vm41_vm1, %v51_v34, 0.0 }
 0x148   :  { %v54_v37 = vadd.f32 %v53_v36, %v52_v35 }
 0x14a   :  { %55 = vadd.xlane.f32.xlu1 %v54_v37 }
 0x1d7   :  { %v56_v42 = vpop.xlane.xlu1 %55 }
 0x1d8   :  { %v63_v43 = vrot.slane %v56_v42, %v62_v41 }
 0x1da   :  { %66 = vst.msk [vmem:[%s117_s2] sm:$0x1] %vm65_vm2, %v63_v43 }

</bundles_post_ra>
